<compile_context>
chip_gen: v6e
topology: v6e:2x2x1
jax: 0.10.0
libtpu: 0.0.40
codegen_flags: <defaults>
</compile_context>

<pallas_src>
import jax
import jax.numpy as jnp
import numpy as np
from jax import lax
from jax.experimental import pallas as pl
from jax.experimental.pallas import tpu as pltpu

LANES = 128  # pad every feature/class dimension to a full vreg lane width


# ----------------------------- kernel ---------------------------------------

def _build_kernel(N, H, C, mxu_dtype):
    NEG = -1e30  # python float -> becomes an in-kernel literal, not a captured constant

    def kernel(adj_ref, x_ref, w1_ref, w2_ref, wfc_ref, out_ref):
        mask = adj_ref[...] != 0           # int8 adjacency -> bool mask, hoisted once
        lane = lax.broadcasted_iota(jnp.int32, (1, LANES), 1)

        def gat(h_cur, w_ref):
            # w_ref packs: [:, :H] = W (bias added via the ones lane of h_cur),
            #              [:, H] = W @ a_l^T,  [:, H+1] = W @ a_r^T  (score projections).
            # bf16 MXU operands, f32 accumulation.
            z = jnp.dot(h_cur.astype(mxu_dtype), w_ref[...],
                        preferred_element_type=jnp.float32)          # (N, LANES) f32
            el = z[:, H:H + 1]                        # (N, 1) source scores
            er = z[:, H + 1:H + 2]                    # (N, 1) destination scores
            e = er + el.T                             # (N_dst, N_src)
            e = jnp.maximum(e, 0.2 * e)               # LeakyReLU(0.2), slope < 1
            e = jnp.where(mask, e, NEG)               # mask non-edges
            m = jnp.max(e, axis=-1, keepdims=True)
            p = jnp.where(mask, jnp.exp(e - m), 0.0)  # un-normalized softmax numerator
            row_sum = jnp.sum(p, axis=-1, keepdims=True)
            acc = jnp.dot(p.astype(mxu_dtype), z.astype(mxu_dtype),
                          preferred_element_type=jnp.float32)
            # Normalize AFTER aggregation: alpha @ z == (p @ z) * (1/row_sum).
            # alpha rows sum to 1 => bias folded into z[:, :H] still aggregates to "+ bias".
            return acc * pl.reciprocal(row_sum, approx=False)

        h1 = jnp.maximum(gat(x_ref[...], w1_ref), 0.0)      # relu(conv1(g, h))
        h1 = jnp.where(lane == LANES - 1, 1.0, h1)          # ones lane -> layer-2 bias
        h2 = jnp.maximum(gat(h1, w2_ref), 0.0)              # relu(conv2(g, h))

        hg = jnp.mean(h2, axis=0, keepdims=True)            # dgl.mean_nodes -> (1, LANES)
        hg = jnp.where(lane == LANES - 1, 1.0, hg)          # ones lane -> fc bias

        logits = jnp.dot(hg, wfc_ref[...], preferred_element_type=jnp.float32)
        logits = jnp.where(lane < C, logits, NEG)           # softmax over real classes only
        shifted = logits - jnp.max(logits, axis=-1, keepdims=True)
        lse = jnp.log(jnp.sum(jnp.exp(shifted), axis=-1, keepdims=True))
        out_ref[...] = jnp.broadcast_to(shifted - lse, out_ref.shape)
        # torch.squeeze(out, 1) is a no-op for num_classes > 1.

    return kernel


# ----------------------------- wrapper ---------------------------------------

def gat_classifier(adj, h, params, *, mxu_dtype=jnp.bfloat16):
    N, in_dim = h.shape
    H = params["w1"].shape[1]
    C = params["wfc"].shape[1]
    assert H + 2 < LANES and C <= LANES and in_dim < LANES
    f32 = jnp.float32

    def fuse(w, al, ar, b, rows):
        we = jnp.zeros((LANES, LANES), f32)
        we = we.at[:rows, :H].set(w.astype(f32))
        we = we.at[:rows, H].set((w @ al.T)[:, 0].astype(f32))      # source-score projection
        we = we.at[:rows, H + 1].set((w @ ar.T)[:, 0].astype(f32))  # dest-score projection
        we = we.at[LANES - 1, :H].set(b[0].astype(f32))             # bias via the ones lane
        return we.astype(mxu_dtype)                                 # bf16 MXU operand

    w1e = fuse(params["w1"], params["al1"], params["ar1"], params["b1"], in_dim)
    w2e = fuse(params["w2"], params["al2"], params["ar2"], params["b2"], H)

    wfce = jnp.zeros((LANES, LANES), f32)                           # classifier head kept f32
    wfce = wfce.at[:H, :C].set(params["wfc"].astype(f32))
    wfce = wfce.at[LANES - 1, :C].set(params["bfc"][0].astype(f32))

    x = jnp.zeros((N, LANES), f32)
    x = x.at[:, :in_dim].set(h.astype(f32))
    x = x.at[:, LANES - 1].set(1.0)                                 # constant ones lane

    adj_i8 = (adj != 0).astype(jnp.int8)                            # 4x smaller DMA / VMEM

    # Single-shot VMEM residency estimate: adj(int8) + ~2 N^2 f32 temps + feature slabs
    # + fused weights. Raise the scoped-VMEM limit only when it is actually needed
    # (cap at v7x's 64 MiB physical VMEM).
    est = N * N * (1 + 2 * 4) + 4 * N * LANES * 4 + 3 * LANES * LANES * 4
    compiler_params = None
    if est > (16 << 20):
        compiler_params = pltpu.CompilerParams(vmem_limit_bytes=min(2 * est, 64 << 20))

    vmem = pl.BlockSpec(memory_space=pltpu.MemorySpace.VMEM)
    out = pl.pallas_call(
        _build_kernel(N, H, C, mxu_dtype),
        out_shape=jax.ShapeDtypeStruct((8, LANES), f32),            # (8,128)-aligned store
        in_specs=[vmem] * 5,
        out_specs=vmem,
        compiler_params=compiler_params,
    )(adj_i8, x, w1e, w2e, wfce)
    return out[:1, :C]


# ----------------------------- pure-JAX reference -----------------------------

def reference(adj, h, p):
    def layer(adj, h, w, al, ar, b):
        z = h @ w
        el = jnp.sum(z * al, axis=-1, keepdims=True)
        er = jnp.sum(z * ar, axis=-1, keepdims=True)
        e = er + el.T
        e = jnp.where(e > 0, e, 0.2 * e)
        e = jnp.where(adj > 0, e, -1e30)
        e = e - jnp.max(e, axis=-1, keepdims=True)
        w_att = jnp.where(adj > 0, jnp.exp(e), 0.0)
        alpha = w_att / jnp.sum(w_att, axis=-1, keepdims=True)
        return alpha @ z + b
    h1 = jnp.maximum(layer(adj, h, p["w1"], p["al1"], p["ar1"], p["b1"]), 0.0)
    h2 = jnp.maximum(layer(adj, h1, p["w2"], p["al2"], p["ar2"], p["b2"]), 0.0)
    hg = jnp.mean(h2, axis=0, keepdims=True)
    logits = hg @ p["wfc"] + p["bfc"]
    return jax.nn.log_softmax(logits, axis=1)


# ----------------------------- main -------------------------------------------

def init_params(key, in_dim, hidden_dim_1, num_classes):
    ks = jax.random.split(key, 8)
    s = 0.1
    f32 = jnp.float32
    return dict(
        w1=(jax.random.normal(ks[0], (in_dim, hidden_dim_1)) * s).astype(f32),
        al1=(jax.random.normal(ks[1], (1, hidden_dim_1)) * s).astype(f32),
        ar1=(jax.random.normal(ks[2], (1, hidden_dim_1)) * s).astype(f32),
        b1=jnp.zeros((1, hidden_dim_1), f32),
        w2=(jax.random.normal(ks[3], (hidden_dim_1, hidden_dim_1)) * s).astype(f32),
        al2=(jax.random.normal(ks[4], (1, hidden_dim_1)) * s).astype(f32),
        ar2=(jax.random.normal(ks[5], (1, hidden_dim_1)) * s).astype(f32),
        b2=jnp.zeros((1, hidden_dim_1), f32),
        wfc=(jax.random.normal(ks[6], (hidden_dim_1, num_classes)) * s).astype(f32),
        bfc=(jax.random.normal(ks[7], (1, num_classes)) * s).astype(f32),
    )


if __name__ == "__main__":
    N, in_dim, hidden_dim_1, num_classes = 16, 8, 32, 2

    key = jax.random.PRNGKey(0)
    k_adj, k_h, k_p = jax.random.split(key, 3)

    # Deterministic random directed graph + self-loops (adj[i, j]: edge j -> i).
    adj = (jax.random.uniform(k_adj, (N, N)) < 0.3).astype(jnp.float32)
    adj = jnp.maximum(adj, jnp.eye(N, dtype=jnp.float32))

    h = jax.random.normal(k_h, (N, in_dim), dtype=jnp.float32)
    params = init_params(k_p, in_dim, hidden_dim_1, num_classes)

    out = jax.block_until_ready(gat_classifier(adj, h, params))
    ref = jax.block_until_ready(reference(adj, h, params))
    # Tolerance loosened from 1e-4/1e-5 because the GAT matmuls now feed the MXU bf16
    # operands (per the performance review); the f32 reference remains the semantics.
    np.testing.assert_allclose(np.asarray(out), np.asarray(ref), rtol=2e-2, atol=2e-3)

    print("KERNEL_OK")
</pallas_src>

<mosaic_0001>
module attributes {stable_mosaic.version = 11 : i64} {
  func.func @kernel(%arg0: memref<16x16xi8, #tpu.memory_space<vmem>>, %arg1: memref<16x128xf32, #tpu.memory_space<vmem>>, %arg2: memref<128x128xbf16, #tpu.memory_space<vmem>>, %arg3: memref<128x128xbf16, #tpu.memory_space<vmem>>, %arg4: memref<128x128xf32, #tpu.memory_space<vmem>>, %arg5: memref<8x128xf32, #tpu.memory_space<vmem>>) attributes {dimension_semantics = [], scalar_prefetch = 0 : i64, scratch_operands = 0 : i64, tpu.core_type = #tpu.core_type<tc>} {
    %c0 = arith.constant 0 : index
    %c0_0 = arith.constant 0 : index
    %0 = vector.load %arg0[%c0, %c0_0] : memref<16x16xi8, #tpu.memory_space<vmem>>, vector<16x16xi8>
    %c0_i8 = arith.constant 0 : i8
    %1 = vector.broadcast %c0_i8 : i8 to vector<16x16xi8>
    %2 = arith.cmpi ne, %0, %1 : vector<16x16xi8>
    %3 = tpu.iota {dimensions = array<i32: 1>} : vector<1x128xi32>
    %c0_1 = arith.constant 0 : index
    %c0_2 = arith.constant 0 : index
    %4 = vector.load %arg1[%c0_1, %c0_2] : memref<16x128xf32, #tpu.memory_space<vmem>>, vector<16x128xf32>
    %5 = arith.truncf %4 : vector<16x128xf32> to vector<16x128xbf16>
    %c0_3 = arith.constant 0 : index
    %c0_4 = arith.constant 0 : index
    %6 = vector.load %arg2[%c0_3, %c0_4] : memref<128x128xbf16, #tpu.memory_space<vmem>>, vector<128x128xbf16>
    %cst = arith.constant dense<0.000000e+00> : vector<16x128xf32>
    %7 = tpu.matmul %5, %6, %cst {dimension_numbers = #tpu.dot_dimension_numbers<[1], [0], [0], [1], [0, 0, 1, 1], [], []>} : vector<16x128xbf16>, vector<128x128xbf16>, vector<16x128xf32> -> vector<16x128xf32>
    %8 = vector.extract_strided_slice %7 {offsets = [0, 32], sizes = [16, 1], strides = [1, 1]} : vector<16x128xf32> to vector<16x1xf32>
    %9 = vector.extract_strided_slice %7 {offsets = [0, 33], sizes = [16, 1], strides = [1, 1]} : vector<16x128xf32> to vector<16x1xf32>
    %10 = tpu.transpose %8, [1, 0] : vector<16x1xf32> -> vector<1x16xf32>
    %11 = vector.broadcast %9 : vector<16x1xf32> to vector<16x16xf32>
    %12 = vector.broadcast %10 : vector<1x16xf32> to vector<16x16xf32>
    %13 = arith.addf %11, %12 : vector<16x16xf32>
    %cst_5 = arith.constant 2.000000e-01 : f32
    %14 = vector.broadcast %cst_5 : f32 to vector<16x16xf32>
    %15 = arith.mulf %14, %13 : vector<16x16xf32>
    %16 = arith.maximumf %13, %15 : vector<16x16xf32>
    %cst_6 = arith.constant -1.000000e+30 : f32
    %17 = vector.broadcast %cst_6 : f32 to vector<16x16xf32>
    %18 = arith.select %2, %16, %17 : vector<16x16xi1>, vector<16x16xf32>
    %cst_7 = arith.constant dense<0xFF800000> : vector<16xf32>
    %19 = vector.multi_reduction <maximumf>, %18, %cst_7 [1] : vector<16x16xf32> to vector<16xf32>
    %20 = vector.shape_cast %19 : vector<16xf32> to vector<16x1xf32>
    %21 = vector.broadcast %20 : vector<16x1xf32> to vector<16x16xf32>
    %22 = arith.subf %18, %21 : vector<16x16xf32>
    %23 = math.exp %22 : vector<16x16xf32>
    %cst_8 = arith.constant 0.000000e+00 : f32
    %24 = vector.broadcast %cst_8 : f32 to vector<16x16xf32>
    %25 = arith.select %2, %23, %24 : vector<16x16xi1>, vector<16x16xf32>
    %cst_9 = arith.constant dense<0.000000e+00> : vector<16xf32>
    %26 = vector.multi_reduction <add>, %25, %cst_9 [1] : vector<16x16xf32> to vector<16xf32>
    %27 = vector.shape_cast %26 : vector<16xf32> to vector<16x1xf32>
    %28 = arith.truncf %25 : vector<16x16xf32> to vector<16x16xbf16>
    %29 = arith.truncf %7 : vector<16x128xf32> to vector<16x128xbf16>
    %cst_10 = arith.constant dense<0.000000e+00> : vector<16x128xf32>
    %30 = tpu.matmul %28, %29, %cst_10 {dimension_numbers = #tpu.dot_dimension_numbers<[1], [0], [0], [1], [0, 0, 1, 1], [], []>} : vector<16x16xbf16>, vector<16x128xbf16>, vector<16x128xf32> -> vector<16x128xf32>
    %31 = tpu.reciprocal %27 : vector<16x1xf32> -> vector<16x1xf32>
    %32 = vector.broadcast %31 : vector<16x1xf32> to vector<16x128xf32>
    %33 = arith.mulf %30, %32 : vector<16x128xf32>
    %cst_11 = arith.constant 0.000000e+00 : f32
    %34 = vector.broadcast %cst_11 : f32 to vector<16x128xf32>
    %35 = arith.maximumf %33, %34 : vector<16x128xf32>
    %c127_i32 = arith.constant 127 : i32
    %36 = vector.broadcast %c127_i32 : i32 to vector<1x128xi32>
    %37 = arith.cmpi eq, %3, %36 : vector<1x128xi32>
    %cst_12 = arith.constant 1.000000e+00 : f32
    %38 = vector.shape_cast %37 : vector<1x128xi1> to vector<1x128xi1>
    %39 = vector.broadcast %38 : vector<1x128xi1> to vector<16x128xi1>
    %40 = vector.broadcast %cst_12 : f32 to vector<16x128xf32>
    %41 = arith.select %39, %40, %35 : vector<16x128xi1>, vector<16x128xf32>
    %42 = arith.truncf %41 : vector<16x128xf32> to vector<16x128xbf16>
    %c0_13 = arith.constant 0 : index
    %c0_14 = arith.constant 0 : index
    %43 = vector.load %arg3[%c0_13, %c0_14] : memref<128x128xbf16, #tpu.memory_space<vmem>>, vector<128x128xbf16>
    %cst_15 = arith.constant dense<0.000000e+00> : vector<16x128xf32>
    %44 = tpu.matmul %42, %43, %cst_15 {dimension_numbers = #tpu.dot_dimension_numbers<[1], [0], [0], [1], [0, 0, 1, 1], [], []>} : vector<16x128xbf16>, vector<128x128xbf16>, vector<16x128xf32> -> vector<16x128xf32>
    %45 = vector.extract_strided_slice %44 {offsets = [0, 32], sizes = [16, 1], strides = [1, 1]} : vector<16x128xf32> to vector<16x1xf32>
    %46 = vector.extract_strided_slice %44 {offsets = [0, 33], sizes = [16, 1], strides = [1, 1]} : vector<16x128xf32> to vector<16x1xf32>
    %47 = tpu.transpose %45, [1, 0] : vector<16x1xf32> -> vector<1x16xf32>
    %48 = vector.broadcast %46 : vector<16x1xf32> to vector<16x16xf32>
    %49 = vector.broadcast %47 : vector<1x16xf32> to vector<16x16xf32>
    %50 = arith.addf %48, %49 : vector<16x16xf32>
    %cst_16 = arith.constant 2.000000e-01 : f32
    %51 = vector.broadcast %cst_16 : f32 to vector<16x16xf32>
    %52 = arith.mulf %51, %50 : vector<16x16xf32>
    %53 = arith.maximumf %50, %52 : vector<16x16xf32>
    %cst_17 = arith.constant -1.000000e+30 : f32
    %54 = vector.broadcast %cst_17 : f32 to vector<16x16xf32>
    %55 = arith.select %2, %53, %54 : vector<16x16xi1>, vector<16x16xf32>
    %cst_18 = arith.constant dense<0xFF800000> : vector<16xf32>
    %56 = vector.multi_reduction <maximumf>, %55, %cst_18 [1] : vector<16x16xf32> to vector<16xf32>
    %57 = vector.shape_cast %56 : vector<16xf32> to vector<16x1xf32>
    %58 = vector.broadcast %57 : vector<16x1xf32> to vector<16x16xf32>
    %59 = arith.subf %55, %58 : vector<16x16xf32>
    %60 = math.exp %59 : vector<16x16xf32>
    %cst_19 = arith.constant 0.000000e+00 : f32
    %61 = vector.broadcast %cst_19 : f32 to vector<16x16xf32>
    %62 = arith.select %2, %60, %61 : vector<16x16xi1>, vector<16x16xf32>
    %cst_20 = arith.constant dense<0.000000e+00> : vector<16xf32>
    %63 = vector.multi_reduction <add>, %62, %cst_20 [1] : vector<16x16xf32> to vector<16xf32>
    %64 = vector.shape_cast %63 : vector<16xf32> to vector<16x1xf32>
    %65 = arith.truncf %62 : vector<16x16xf32> to vector<16x16xbf16>
    %66 = arith.truncf %44 : vector<16x128xf32> to vector<16x128xbf16>
    %cst_21 = arith.constant dense<0.000000e+00> : vector<16x128xf32>
    %67 = tpu.matmul %65, %66, %cst_21 {dimension_numbers = #tpu.dot_dimension_numbers<[1], [0], [0], [1], [0, 0, 1, 1], [], []>} : vector<16x16xbf16>, vector<16x128xbf16>, vector<16x128xf32> -> vector<16x128xf32>
    %68 = tpu.reciprocal %64 : vector<16x1xf32> -> vector<16x1xf32>
    %69 = vector.broadcast %68 : vector<16x1xf32> to vector<16x128xf32>
    %70 = arith.mulf %67, %69 : vector<16x128xf32>
    %cst_22 = arith.constant 0.000000e+00 : f32
    %71 = vector.broadcast %cst_22 : f32 to vector<16x128xf32>
    %72 = arith.maximumf %70, %71 : vector<16x128xf32>
    %cst_23 = arith.constant dense<0.000000e+00> : vector<128xf32>
    %73 = vector.multi_reduction <add>, %72, %cst_23 [0] : vector<16x128xf32> to vector<128xf32>
    %74 = vector.shape_cast %73 : vector<128xf32> to vector<1x128xf32>
    %cst_24 = arith.constant 1.600000e+01 : f32
    %75 = vector.broadcast %cst_24 : f32 to vector<1x128xf32>
    %76 = arith.divf %74, %75 : vector<1x128xf32>
    %c127_i32_25 = arith.constant 127 : i32
    %77 = vector.broadcast %c127_i32_25 : i32 to vector<1x128xi32>
    %78 = arith.cmpi eq, %3, %77 : vector<1x128xi32>
    %cst_26 = arith.constant 1.000000e+00 : f32
    %79 = vector.broadcast %cst_26 : f32 to vector<1x128xf32>
    %80 = arith.select %78, %79, %76 : vector<1x128xi1>, vector<1x128xf32>
    %c0_27 = arith.constant 0 : index
    %c0_28 = arith.constant 0 : index
    %81 = vector.load %arg4[%c0_27, %c0_28] : memref<128x128xf32, #tpu.memory_space<vmem>>, vector<128x128xf32>
    %cst_29 = arith.constant dense<0.000000e+00> : vector<1x128xf32>
    %82 = tpu.matmul %80, %81, %cst_29 {dimension_numbers = #tpu.dot_dimension_numbers<[1], [0], [0], [1], [0, 0, 1, 1], [], []>} : vector<1x128xf32>, vector<128x128xf32>, vector<1x128xf32> -> vector<1x128xf32>
    %c2_i32 = arith.constant 2 : i32
    %83 = vector.broadcast %c2_i32 : i32 to vector<1x128xi32>
    %84 = arith.cmpi slt, %3, %83 : vector<1x128xi32>
    %cst_30 = arith.constant -1.000000e+30 : f32
    %85 = vector.broadcast %cst_30 : f32 to vector<1x128xf32>
    %86 = arith.select %84, %82, %85 : vector<1x128xi1>, vector<1x128xf32>
    %cst_31 = arith.constant dense<0xFF800000> : vector<1xf32>
    %87 = vector.multi_reduction <maximumf>, %86, %cst_31 [1] : vector<1x128xf32> to vector<1xf32>
    %88 = vector.shape_cast %87 : vector<1xf32> to vector<1x1xf32>
    %89 = vector.broadcast %88 : vector<1x1xf32> to vector<1x128xf32>
    %90 = arith.subf %86, %89 : vector<1x128xf32>
    %91 = math.exp %90 : vector<1x128xf32>
    %cst_32 = arith.constant dense<0.000000e+00> : vector<1xf32>
    %92 = vector.multi_reduction <add>, %91, %cst_32 [1] : vector<1x128xf32> to vector<1xf32>
    %93 = vector.shape_cast %92 : vector<1xf32> to vector<1x1xf32>
    %94 = math.log %93 : vector<1x1xf32>
    %95 = vector.broadcast %94 : vector<1x1xf32> to vector<1x128xf32>
    %96 = arith.subf %90, %95 : vector<1x128xf32>
    %97 = vector.shape_cast %96 : vector<1x128xf32> to vector<1x128xf32>
    %98 = vector.broadcast %97 : vector<1x128xf32> to vector<8x128xf32>
    %c0_33 = arith.constant 0 : index
    %c0_34 = arith.constant 0 : index
    %99 = vector.load %arg5[%c0_33, %c0_34] : memref<8x128xf32, #tpu.memory_space<vmem>>, vector<8x128xf32>
    tpu.vector_store %arg5[%c0_33, %c0_34], %98 {strides = array<i32>} : memref<8x128xf32, #tpu.memory_space<vmem>>, vector<8x128xf32>,
    return
  }
}

</mosaic_0001>

<bundles_post_ra>
// kernel: tpu_custom_call.1
= control target key start
LH: loop header
LB: loop body
LE: loop exit
PB: predicated region body
PF: predicated region fallthrough
CT: control target
= control target key end

     0   :  { %10 = vsyncpa [#allocation3], 0  ;;  %s1218_s0 = inlined_call_operand.hbm [shape: s8[16,16], index: 0, kind: input, shape index: {}]   ;;  %s1219_s1 = inlined_call_operand.hbm [shape: f32[16,128], index: 1, kind: input, shape index: {}]   ;;  %s1220_s2 = inlined_call_operand.hbm [shape: bf16[128,128], index: 2, kind: input, shape index: {}]   ;;  %s1221_s3 = inlined_call_operand.hbm [shape: bf16[128,128], index: 3, kind: input, shape index: {}]   ;;  %s1222_s4 = inlined_call_operand.hbm [shape: f32[128,128], index: 4, kind: input, shape index: {}]   ;;  %s1223_s5 = inlined_call_operand.hbm [shape: f32[8,128], index: 5, kind: output, shape index: {}]  }
   0x1   :  { %11 = vsyncpa [#allocation6], 0 }
   0x2   :  { %12 = vsyncpa [#allocation9], 0 }
   0x3   :  { %13 = vsyncpa [#allocation4], 0  ;;  %s1048_s18 = smov [#allocation5]  }
   0x4   :  { %s31_s19 = sshll.u32 %s1048_s18, 4  ;;  %s32_s19 = int_to_ptr.vmem [resolvable:$true] %s31_s19 }
   0x5   :  { %s928_s20 = scalar_lea.vmem %s32_s19, 256  ;;  %p933_p1 = scmp.lt.s32.totalorder %s32_s19, %s32_s19 }
   0x6   :  { %p929_p0 = scmp.ne.s32.totalorder %s32_s19, %s928_s20  ;;  %p934_p2 = scmp.lt.s32.totalorder %s928_s20, %s928_s20 }
   0x8   :  { %p935_p3 = por %p934_p2, %p933_p1 }
   0xa   :  { %p936_p4 = pnand %p935_p3, %p929_p0 }
   0xc   :  { %939 = shalt.err (!%p936_p4)
}
   0xd   :  { %s1049_s21 = smov 128   ;;  %s1050_s22 = smov 8  }
   0xe   :  { %37 = dma.hbm_to_vmem [thread:$0]  %s1219_s1, 256, %s32_s19, [#allocation6], %s1049_s21, %s1049_s21, %s1050_s22  }
   0xf   :  { %s1051_s25 = smov [#allocation8]   ;;  %s1052_s27 = smov [#allocation2]  }
  0x10   :  { %s55_s26 = sshll.u32 %s1051_s25, 4  ;;  %s19_s28 = sshll.u32 %s1052_s27, 4  ;;  %s56_s26 = int_to_ptr.vmem [resolvable:$true] %s55_s26  ;;  %s20_s28 = int_to_ptr.vmem [resolvable:$true] %s19_s28 }
  0x11   :  { %s948_s29 = scalar_lea.vmem %s56_s26, 1024  ;;  %p953_p6 = scmp.lt.s32.totalorder %s56_s26, %s56_s26 }
  0x12   :  { %p949_p5 = scmp.ne.s32.totalorder %s56_s26, %s948_s29  ;;  %p954_p7 = scmp.lt.s32.totalorder %s948_s29, %s948_s29 }
  0x14   :  { %p955_p8 = por %p954_p7, %p953_p6 }
  0x16   :  { %p956_p9 = pnand %p955_p8, %p949_p5 }
  0x18   :  { %959 = shalt.err (!%p956_p9)
}
  0x19   :  { %s1053_s30 = smov 64   ;;  %s1054_s6 = smov 4  }
  0x1a   :  { %61 = dma.hbm_to_vmem [thread:$0]  %s1221_s3, 1024, %s56_s26, [#allocation9], %s1053_s30, %s1053_s30, %s1054_s6  }
  0x1b   :  { %s968_s1 = scalar_lea.vmem %s20_s28, 64  ;;  %p973_p11 = scmp.lt.s32.totalorder %s20_s28, %s20_s28 }
  0x1c   :  { %p969_p10 = scmp.ne.s32.totalorder %s20_s28, %s968_s1  ;;  %p974_p12 = scmp.lt.s32.totalorder %s968_s1, %s968_s1 }
  0x1e   :  { %p975_p13 = por %p974_p12, %p973_p11 }
  0x20   :  { %p976_p0 = pnand %p975_p13, %p969_p10 }
  0x22   :  { %979 = shalt.err (!%p976_p0)
}
  0x23   :  { %s1055_s9 = smov 32   ;;  %s1056_s10 = smov 2  }
  0x24   :  { %25 = dma.hbm_to_vmem [thread:$0]  %s1218_s0, 64, %s20_s28, [#allocation3], %s1055_s9, %s1055_s9, %s1056_s10  }
  0x25   :  { %s1057_s13 = smov [#allocation7]   ;;  %s1058_s15 = smov [#allocation10]  }
  0x26   :  { %s43_s14 = sshll.u32 %s1057_s13, 4  ;;  %s67_s16 = sshll.u32 %s1058_s15, 4  ;;  %s44_s14 = int_to_ptr.vmem [resolvable:$true] %s43_s14  ;;  %s68_s16 = int_to_ptr.vmem [resolvable:$true] %s67_s16 }
  0x27   :  { %s988_s3 = scalar_lea.vmem %s44_s14, 1024  ;;  %p993_p2 = scmp.lt.s32.totalorder %s44_s14, %s44_s14 }
  0x28   :  { %p989_p1 = scmp.ne.s32.totalorder %s44_s14, %s988_s3  ;;  %p994_p3 = scmp.lt.s32.totalorder %s988_s3, %s988_s3 }
  0x2a   :  { %p995_p4 = por %p994_p3, %p993_p2 }
  0x2c   :  { %p996_p5 = pnand %p995_p4, %p989_p1 }
  0x2e   :  { %999 = shalt.err (!%p996_p5)
}
  0x2f   :  { %49 = dma.hbm_to_vmem [thread:$0]  %s1220_s2, 1024, %s44_s14, [#allocation6], %s1053_s30, %s1053_s30, %s1054_s6  }
  0x30   :  { %s1008_s19 = scalar_lea.vmem %s68_s16, 2048  ;;  %p1013_p7 = scmp.lt.s32.totalorder %s68_s16, %s68_s16 }
  0x31   :  { %p1009_p6 = scmp.ne.s32.totalorder %s68_s16, %s1008_s19  ;;  %p1014_p8 = scmp.lt.s32.totalorder %s1008_s19, %s1008_s19 }
  0x33   :  { %p1015_p9 = por %p1014_p8, %p1013_p7 }
  0x35   :  { %p1016_p10 = pnand %p1015_p9, %p1009_p6 }
  0x37   :  { %1019 = shalt.err (!%p1016_p10)
}
  0x38   :  { %73 = dma.hbm_to_vmem [thread:$0]  %s1222_s4, 2048, %s68_s16, [#allocation9], %s1049_s21, %s1049_s21, %s1050_s22  }
  0x39   :  { %1040 = dma.done.wait [#allocation3], 64  }
  0x3a   :  { %1041 = vsyncadd [#allocation3], 4294967232 }
  0x3b   :  { %1042 = dma.done.wait [#allocation6], 1280  }
  0x3c   :  { %1043 = vsyncadd [#allocation6], 4294966016 }
  0x3d   :  { %1044 = dma.done.wait [#allocation9], 3072  }
  0x3e   :  { %1045 = vsyncadd [#allocation9], 4294964224  ;;  %v1059_v0 = vmov 0.0   ;;  %vm1060_vm0 = vmmov 0   ;;  %v1061_v1 = vmov 33   ;;  %v884_v2 = vld [vmem:[#allocation7 + $0x38] sm:$0xff]   ;;  %v96_v20 = vlaneseq }
  0x3f   :  { %778 = vmatprep.subr.bf16.mxu0 %v1059_v0  ;;  %794 = vmatprep.mubr.msk.bf16.mxu0 %vm1060_vm0, %v1059_v0  ;;  %v885_v3 = vld [vmem:[#allocation7 + $0x30] sm:$0xff]   ;;  %v886_v4 = vld [vmem:[#allocation7 + $0x28] sm:$0xff]   ;;  %v887_v5 = vld [vmem:[#allocation7 + $0x20] sm:$0xff]   ;;  %s1062_s2 = smov 96   ;;  %v1063_v26 = vmov 0   ;;  %vm272_vm5 = vcmask 130048  }
  0x40   :  { %882 = vset.pattern.permute.xlu1 %v1061_v1  ;;  %804 = vmatprep.subr.bf16.mxu1 %v1059_v0  ;;  %v888_v6 = vld [vmem:[#allocation7 + $0x18] sm:$0xff]   ;;  %v889_v7 = vld [vmem:[#allocation7 + $0x10] sm:$0xff]   ;;  %v890_v8 = vld [vmem:[#allocation7 + $0x8] sm:$0xff]   ;;  %v255_v21 = vshrl.u32 %v96_v20, 7  ;;  %vm686_vm8 = vcmask 1040384   ;;  %s1064_s4 = smov [#allocation11]  }
  0x41   :  { %820 = vmatprep.mubr.msk.bf16.mxu1 %vm1060_vm0, %v1059_v0  ;;  %779 = vmatpush3.bf16.msra.mxu0 %v884_v2  ;;  %v891_v9 = vld [vmem:[#allocation7] sm:$0xff]   ;;  %v98_v10 = vld [vmem:[#allocation5] sm:$0xff]  ;;  %v99_v11 = vld [vmem:[#allocation5 + $0x8] sm:$0xff]  ;;  %s710_s21 = sshll.u32 %s1064_s4, 4  ;;  %s711_s21 = int_to_ptr.vmem [resolvable:$true] %s710_s21 }
  0x42   :  { %780 = vmatprep.subr.bf16.mxu0 %v1059_v0  ;;  %v100_v12 = vpack.c.bf16 %v99_v11, %v98_v10  ;;  %v93_v22 = vld [vmem:[#allocation2 + $0x2] sm:$0x3]  ;;  %v92_v23 = vld [vmem:[#allocation2] sm:$0x3]  ;;  %v1136_v25 = vsub.s32 0, %v255_v21  ;;  %v892_v59 = vld [vmem:[#allocation8 + $0x38] sm:$0xff]   ;;  %p1025_p12 = scmp.lt.s32.totalorder %s711_s21, %s711_s21 }
  0x43   :  { %vm95_vm1 = vnez %v93_v22  ;;  %vm94_vm2 = vnez %v92_v23  ;;  %805 = vmatpush3.bf16.msra.mxu1 %v892_v59  ;;  %v893_v60 = vld [vmem:[#allocation8 + $0x30] sm:$0xff]   ;;  %v894_v61 = vld [vmem:[#allocation8 + $0x28] sm:$0xff]   ;;  %v895_v62 = vld [vmem:[#allocation8 + $0x20] sm:$0xff]   ;;  %s1020_s22 = scalar_lea.vmem %s711_s21, 128 }
  0x44   :  { %v265_v27 = vsel %vm95_vm1, 16843009, %v1063_v26  ;;  %v264_v28 = vsel %vm94_vm2, 16843009, %v1063_v26  ;;  %806 = vmatprep.subr.bf16.mxu1 %v1059_v0  ;;  %v896_v63 = vld [vmem:[#allocation8 + $0x18] sm:$0xff]   ;;  %v898_v2 = vld [vmem:[#allocation8 + $0x8] sm:$0xff]   ;;  %p1021_p11 = scmp.ne.s32.totalorder %s711_s21, %s1020_s22  ;;  %p1026_p13 = scmp.lt.s32.totalorder %s1020_s22, %s1020_s22 }
  0x45   :  { %781 = vmatpush3.bf16.msra.mxu0 %v885_v3  ;;  %v267_v32 = vunpack.c.0.s8 %v265_v27  ;;  %v266_v33 = vunpack.c.0.s8 %v264_v28  ;;  %v899_v3 = vld [vmem:[#allocation8] sm:$0xff]   ;;  %v611_v39 = vld [vmem:[#allocation10 + $0x68] sm:$0xff]  ;;  %v609_v59 = vld [vmem:[#allocation10 + $0x58] sm:$0xff] }
  0x46   :  { %782 = vmatprep.subr.bf16.mxu0 %v1059_v0  ;;  %v610_v38 = vld [vmem:[#allocation10 + $0x60] sm:$0xff]  ;;  %p1027_p0 = por %p1026_p13, %p1025_p12 }
  0x47   :  { %vm1139_vm3 = vcmp.ne.s32.totalorder %v267_v32, 0  ;;  %vm1143_vm4 = vcmp.ne.s32.totalorder %v266_v33, 0  ;;  %807 = vmatpush3.bf16.msra.mxu1 %v893_v60  ;;  %v608_v60 = vld [vmem:[#allocation10 + $0x50] sm:$0xff] }
  0x48   :  { %808 = vmatprep.subr.bf16.mxu1 %v1059_v0  ;;  %p1028_p1 = pnand %p1027_p0, %p1021_p11 }
  0x49   :  { %783 = vmatpush3.bf16.msra.mxu0 %v886_v4 }
  0x4a   :  { %784 = vmatprep.subr.bf16.mxu0 %v1059_v0 }
  0x4b   :  { %809 = vmatpush3.bf16.msra.mxu1 %v894_v61  ;;  %v607_v61 = vld [vmem:[#allocation10 + $0x48] sm:$0xff] }
  0x4c   :  { %810 = vmatprep.subr.bf16.mxu1 %v1059_v0 }
  0x4d   :  { %785 = vmatpush3.bf16.msra.mxu0 %v887_v5 }
  0x4e   :  { %786 = vmatprep.subr.bf16.mxu0 %v1059_v0 }
  0x4f   :  { %811 = vmatpush3.bf16.msra.mxu1 %v895_v62  ;;  %v606_v62 = vld [vmem:[#allocation10 + $0x40] sm:$0xff] }
  0x50   :  { %812 = vmatprep.subr.bf16.mxu1 %v1059_v0 }
  0x51   :  { %787 = vmatpush3.bf16.msra.mxu0 %v888_v6 }
  0x52   :  { %788 = vmatprep.subr.bf16.mxu0 %v1059_v0 }
  0x53   :  { %813 = vmatpush3.bf16.msra.mxu1 %v896_v63  ;;  %v605_v63 = vld [vmem:[#allocation10 + $0x38] sm:$0xff] }
  0x54   :  { %814 = vmatprep.subr.bf16.mxu1 %v1059_v0 }
  0x55   :  { %789 = vmatpush3.bf16.msra.mxu0 %v889_v7 }
  0x56   :  { %790 = vmatprep.subr.bf16.mxu0 %v1059_v0 }
  0x59   :  { %791 = vmatpush3.bf16.msra.mxu0 %v890_v8 }
  0x5a   :  { %792 = vmatprep.subr.bf16.mxu0 %v1059_v0 }
  0x5d   :  { %793 = vmatpush3.bf16.msra.mxu0 %v891_v9  ;;  %v1171_v9 = vand.u32 127, %v96_v20 }
  0x5e   :  { %798 = vmatprep.subr.bf16.mxu0 %v1059_v0 }
  0x5f   :  { %vm345_vm6 = vcmp.eq.s32.totalorder %v1171_v9, 127  ;;  %vm684_vm7 = vcmp.lt.s32.totalorder %v1171_v9, 2 }
  0x60   :  { %795 = vmatmul.mubr.bf16.vlgmr.msra.gmra.mxu0 %v100_v12 }
  0x61   :  { %800 = vmatprep.mubr.msk.bf16.mxu0 %vm1060_vm0, %v1059_v0 }
 0x120   :  { %v199_v13 = vpop.f32.mrf.mxu0 }
 0x121   :  { %247 = vperm.xlu1 %882, %v199_v13   ;;  %208 = vrot.lane.b32.xlu0 %v199_v13, %s1062_s2 }
 0x122   :  { %v796_v14 = vpop.f32.mrf.mxu0 }
 0x124   :  { %v202_v15 = vpop.f32.mrf.mxu0 }
 0x125   :  { %v294_v16 = vpack.c.bf16 %v202_v15, %v199_v13  ;;  %251 = vperm.xlu1 %882, %v202_v15   ;;  %210 = vrot.lane.b32.xlu0 %v202_v15, %s1062_s2 }
 0x126   :  { %v797_v17 = vpop.f32.mrf.mxu0 }
 0x127   :  { %799 = vmatpush3.bf16.msra.mxu0 %v294_v16 }
 0x128   :  { %824 = vmatprep.subr.bf16.mxu0 %v1059_v0 }
 0x193   :  { %v209_v18 = vpop.permute.xlu0 %208 }
 0x194   :  { %214 = vxpose.xlu0.b32.start [1/2] (short) (narrow) %v209_v18, 8 }
 0x197   :  { %v211_v19 = vpop.permute.xlu0 %210 }
 0x198   :  { %215 = vxpose.xlu0.b32.end [2/2] (short) (narrow) %v211_v19, 8 }
 0x19c   :  { %v248_v24 = vpop.permute.xlu1 %247 }
 0x1a0   :  { %v252_v31 = vpop.permute.xlu1 %251 }
 0x1c1   :  { %883 = vset.pattern.permute.xlu0 %v1061_v1  ;;  %v897_v1 = vld [vmem:[#allocation8 + $0x10] sm:$0xff]  }
 0x1c2   :  { %815 = vmatpush3.bf16.msra.mxu1 %v897_v1  ;;  %v604_v1 = vld [vmem:[#allocation10 + $0x30] sm:$0xff] }
 0x1c3   :  { %816 = vmatprep.subr.bf16.mxu1 %v1059_v0 }
 0x1c6   :  { %817 = vmatpush3.bf16.msra.mxu1 %v898_v2  ;;  %v603_v2 = vld [vmem:[#allocation10 + $0x28] sm:$0xff] }
 0x1c7   :  { %818 = vmatprep.subr.bf16.mxu1 %v1059_v0 }
 0x1ca   :  { %819 = vmatpush3.bf16.msra.mxu1 %v899_v3  ;;  %v602_v3 = vld [vmem:[#allocation10 + $0x20] sm:$0xff] }
 0x1cb   :  { %830 = vmatprep.subr.mxu1 %v1059_v0 }
 0x210   :  { %v230_v29 = vpop.trf.xlu0 }
 0x211   :  { %v257_v30 = vrot.slane %v230_v29, %v1136_v25 }
 0x213   :  { %v258_v34 = vadd.f32 %v257_v30, %v248_v24  ;;  %v259_v35 = vadd.f32 %v257_v30, %v252_v31 }
 0x215   :  { %v260_v36 = vmul.f32 0.2, %v258_v34  ;;  %v261_v37 = vmul.f32 0.2, %v259_v35 }
 0x217   :  { %v263_v40 = vmax.f32 %v259_v35, %v261_v37  ;;  %v262_v41 = vmax.f32 %v258_v34, %v260_v36 }
 0x219   :  { %v271_v42 = vsel %vm1139_vm3, %v263_v40, -1e+30  ;;  %v270_v43 = vsel %vm1143_vm4, %v262_v41, -1e+30 }
 0x21a   :  { %v276_v44 = vsel %vm272_vm5, %v271_v42, -inf  ;;  %v273_v45 = vsel %vm272_vm5, %v270_v43, -inf }
 0x21b   :  { %277 = vmax.xlane.f32.xlu0 %v276_v44  ;;  %274 = vmax.xlane.f32.xlu1 %v273_v45 }
 0x2a4   :  { %v278_v46 = vpop.xlane.xlu0 %277  ;;  %v275_v47 = vpop.xlane.xlu1 %274 }
 0x2a5   :  { %v280_v48 = vsub.f32 %v271_v42, %v278_v46  ;;  %v279_v49 = vsub.f32 %v270_v43, %v275_v47 }
 0x2a7   :  { %v283_v50 = vmul.f32 1.442695, %v280_v48  ;;  %v281_v51 = vmul.f32 1.442695, %v279_v49 }
 0x2a9   :  { %900 = vpow2.f32 %v283_v50 }
 0x2aa   :  { %902 = vpow2.f32 %v281_v51 }
 0x2b6   :  { %v901_v52 = vpop.eup %900 }
 0x2b7   :  { %v903_v53 = vpop.eup %902  ;;  %v286_v54 = vsel %vm1139_vm3, %v901_v52, 0.0 }
 0x2b8   :  { %v285_v55 = vsel %vm1143_vm4, %v903_v53, 0.0  ;;  %v290_v58 = vsel %vm272_vm5, %v286_v54, 0.0 }
 0x2b9   :  { %v287_v56 = vsel %vm272_vm5, %v285_v55, 0.0  ;;  %v293_v57 = vpack.c.bf16 %v286_v54, %v285_v55 }
 0x2ba   :  { %288 = vadd.xlane.f32.xlu1 %v287_v56 }
 0x2bb   :  { %801 = vmatmul.mubr.msk.bf16.vlgmr.msra.gmra.mxu0 %vm272_vm5, %v293_v57  ;;  %v613_v57 = vld [vmem:[#allocation10 + $0x78] sm:$0xff] }
 0x2bc   :  { %826 = vmatprep.mubr.msk.bf16.mxu0 %vm1060_vm0, %v1059_v0 }
 0x2be   :  { %291 = vadd.xlane.f32.xlu1 %v290_v58  ;;  %v612_v58 = vld [vmem:[#allocation10 + $0x70] sm:$0xff] }
 0x343   :  { %v289_v4 = vpop.xlane.xlu1 %288 }
 0x344   :  { %904 = vrcp.f32 %v289_v4  ;;  %v601_v4 = vld [vmem:[#allocation10 + $0x18] sm:$0xff] }
 0x347   :  { %v292_v5 = vpop.xlane.xlu1 %291 }
 0x348   :  { %906 = vrcp.f32 %v292_v5  ;;  %v600_v5 = vld [vmem:[#allocation10 + $0x10] sm:$0xff] }
 0x351   :  { %v905_v6 = vpop.eup %904 }
 0x355   :  { %v907_v11 = vpop.eup %906 }
 0x37b   :  { %v332_v7 = vpop.f32.mrf.mxu0 }
 0x37c   :  { %v341_v8 = vmul.f32 %v905_v6, %v332_v7  ;;  %v599_v6 = vld [vmem:[#allocation10 + $0x8] sm:$0xff]  ;;  %v598_v7 = vld [vmem:[#allocation10] sm:$0xff] }
 0x37d   :  { %v802_v10 = vpop.f32.mrf.mxu0 }
 0x37e   :  { %v343_v13 = vmax.f32 %v341_v8, 0.0 }
 0x37f   :  { %v335_v12 = vpop.f32.mrf.mxu0 }
 0x380   :  { %v342_v14 = vmul.f32 %v907_v11, %v335_v12  ;;  %v348_v17 = vsel %vm345_vm6, 1.0, %v343_v13 }
 0x381   :  { %v803_v15 = vpop.f32.mrf.mxu0 }
 0x382   :  { %v344_v16 = vmax.f32 %v342_v14, 0.0 }
 0x384   :  { %v349_v18 = vsel %vm345_vm6, 1.0, %v344_v16 }
 0x385   :  { %v350_v19 = vpack.c.bf16 %v349_v18, %v348_v17 }
 0x387   :  { %821 = vmatmul.mubr.bf16.vlgmr.msra.gmra.mxu1 %v350_v19 }
 0x388   :  { %862 = vmatprep.mubr.msk.f32.mxu1 %vm1060_vm0, %v1059_v0  ;;  %831 = vmatpush3.msra.mxu1 %v613_v57 }
 0x389   :  { %832 = vmatprep.subr.mxu1 %v1059_v0 }
 0x38a   :  { %833 = vmatpush3.msra.mxu1 %v612_v58 }
 0x38b   :  { %834 = vmatprep.subr.mxu1 %v1059_v0 }
 0x38c   :  { %835 = vmatpush3.msra.mxu1 %v611_v39 }
 0x38d   :  { %836 = vmatprep.subr.mxu1 %v1059_v0 }
 0x38e   :  { %837 = vmatpush3.msra.mxu1 %v610_v38 }
 0x38f   :  { %838 = vmatprep.subr.mxu1 %v1059_v0 }
 0x390   :  { %839 = vmatpush3.msra.mxu1 %v609_v59 }
 0x391   :  { %840 = vmatprep.subr.mxu1 %v1059_v0 }
 0x392   :  { %841 = vmatpush3.msra.mxu1 %v608_v60 }
 0x393   :  { %842 = vmatprep.subr.mxu1 %v1059_v0 }
 0x394   :  { %843 = vmatpush3.msra.mxu1 %v607_v61 }
 0x395   :  { %844 = vmatprep.subr.mxu1 %v1059_v0 }
 0x396   :  { %845 = vmatpush3.msra.mxu1 %v606_v62 }
 0x397   :  { %846 = vmatprep.subr.mxu1 %v1059_v0 }
 0x398   :  { %847 = vmatpush3.msra.mxu1 %v605_v63 }
 0x399   :  { %848 = vmatprep.subr.mxu1 %v1059_v0 }
 0x39a   :  { %849 = vmatpush3.msra.mxu1 %v604_v1 }
 0x39b   :  { %850 = vmatprep.subr.mxu1 %v1059_v0 }
 0x39c   :  { %851 = vmatpush3.msra.mxu1 %v603_v2 }
 0x39d   :  { %852 = vmatprep.subr.mxu1 %v1059_v0 }
 0x39e   :  { %853 = vmatpush3.msra.mxu1 %v602_v3 }
 0x39f   :  { %854 = vmatprep.subr.mxu1 %v1059_v0 }
 0x3a0   :  { %855 = vmatpush3.msra.mxu1 %v601_v4 }
 0x3a1   :  { %856 = vmatprep.subr.mxu1 %v1059_v0 }
 0x3a2   :  { %857 = vmatpush3.msra.mxu1 %v600_v5 }
 0x3a3   :  { %858 = vmatprep.subr.mxu1 %v1059_v0 }
 0x3a4   :  { %859 = vmatpush3.msra.mxu1 %v599_v6 }
 0x3a5   :  { %860 = vmatprep.subr.mxu1 %v1059_v0 }
 0x3a6   :  { %861 = vmatpush3.msra.mxu1 %v598_v7 }
 0x447   :  { %v449_v20 = vpop.f32.mrf.mxu1 }
 0x448   :  { %458 = vrot.lane.b32.xlu1 %v449_v20, %s1062_s2 }
 0x449   :  { %v822_v21 = vpop.f32.mrf.mxu1 }
 0x44b   :  { %v452_v22 = vpop.f32.mrf.mxu1 }
 0x44c   :  { %v537_v23 = vpack.c.bf16 %v452_v22, %v449_v20  ;;  %460 = vrot.lane.b32.xlu1 %v452_v22, %s1062_s2 }
 0x44d   :  { %v823_v24 = vpop.f32.mrf.mxu1 }
 0x44e   :  { %825 = vmatpush3.bf16.msra.mxu0 %v537_v23 }
 0x450   :  { %497 = vperm.xlu1 %882, %v449_v20  }
 0x454   :  { %501 = vperm.xlu1 %882, %v452_v22  }
 0x4ba   :  { %v459_v26 = vpop.permute.xlu1 %458 }
 0x4bb   :  { %464 = vxpose.xlu1.b32.start [1/2] (short) (narrow) %v459_v26, 8 }
 0x4be   :  { %v461_v27 = vpop.permute.xlu1 %460 }
 0x4bf   :  { %465 = vxpose.xlu1.b32.end [2/2] (short) (narrow) %v461_v27, 8 }
 0x4cb   :  { %v498_v28 = vpop.permute.xlu1 %497 }
 0x4cf   :  { %v502_v29 = vpop.permute.xlu1 %501 }
 0x537   :  { %v480_v30 = vpop.trf.xlu1 }
 0x538   :  { %v507_v31 = vrot.slane %v480_v30, %v1136_v25 }
 0x53a   :  { %v508_v32 = vadd.f32 %v507_v31, %v498_v28  ;;  %v509_v33 = vadd.f32 %v507_v31, %v502_v29 }
 0x53c   :  { %v510_v34 = vmul.f32 0.2, %v508_v32  ;;  %v511_v35 = vmul.f32 0.2, %v509_v33 }
 0x53e   :  { %v512_v36 = vmax.f32 %v508_v32, %v510_v34  ;;  %v513_v37 = vmax.f32 %v509_v33, %v511_v35 }
 0x540   :  { %v514_v40 = vsel %vm1143_vm4, %v512_v36, -1e+30  ;;  %v515_v42 = vsel %vm1139_vm3, %v513_v37, -1e+30 }
 0x541   :  { %v516_v41 = vsel %vm272_vm5, %v514_v40, -inf  ;;  %v519_v43 = vsel %vm272_vm5, %v515_v42, -inf }
 0x542   :  { %517 = vmax.xlane.f32.xlu0 %v516_v41 }
 0x546   :  { %520 = vmax.xlane.f32.xlu0 %v519_v43 }
 0x5cb   :  { %v518_v44 = vpop.xlane.xlu0 %517 }
 0x5cc   :  { %v522_v45 = vsub.f32 %v514_v40, %v518_v44 }
 0x5ce   :  { %v524_v46 = vmul.f32 1.442695, %v522_v45 }
 0x5cf   :  { %v521_v47 = vpop.xlane.xlu0 %520 }
 0x5d0   :  { %908 = vpow2.f32 %v524_v46  ;;  %v523_v48 = vsub.f32 %v515_v42, %v521_v47 }
 0x5d2   :  { %v526_v49 = vmul.f32 1.442695, %v523_v48 }
 0x5d4   :  { %910 = vpow2.f32 %v526_v49 }
 0x5dd   :  { %v909_v50 = vpop.eup %908 }
 0x5de   :  { %v528_v51 = vsel %vm1143_vm4, %v909_v50, 0.0 }
 0x5df   :  { %v530_v52 = vsel %vm272_vm5, %v528_v51, 0.0 }
 0x5e0   :  { %531 = vadd.xlane.f32.xlu0 %v530_v52 }
 0x5e1   :  { %v911_v53 = vpop.eup %910 }
 0x5e2   :  { %v529_v54 = vsel %vm1139_vm3, %v911_v53, 0.0 }
 0x5e3   :  { %v533_v55 = vsel %vm272_vm5, %v529_v54, 0.0  ;;  %v536_v56 = vpack.c.bf16 %v529_v54, %v528_v51 }
 0x5e4   :  { %534 = vadd.xlane.f32.xlu0 %v533_v55 }
 0x5e5   :  { %827 = vmatmul.mubr.msk.bf16.vlgmr.msra.gmra.mxu0 %vm272_vm5, %v536_v56 }
 0x669   :  { %v532_v8 = vpop.xlane.xlu0 %531 }
 0x66a   :  { %912 = vrcp.f32 %v532_v8 }
 0x66d   :  { %v535_v10 = vpop.xlane.xlu0 %534 }
 0x66e   :  { %914 = vrcp.f32 %v535_v10 }
 0x677   :  { %v913_v12 = vpop.eup %912 }
 0x67b   :  { %v915_v15 = vpop.eup %914 }
 0x6a5   :  { %v575_v11 = vpop.f32.mrf.mxu0 }
 0x6a6   :  { %v584_v14 = vmul.f32 %v913_v12, %v575_v11 }
 0x6a7   :  { %v828_v13 = vpop.f32.mrf.mxu0 }
 0x6a8   :  { %v586_v19 = vmax.f32 %v584_v14, 0.0 }
 0x6a9   :  { %v578_v16 = vpop.f32.mrf.mxu0 }
 0x6aa   :  { %v585_v17 = vmul.f32 %v915_v15, %v578_v16 }
 0x6ab   :  { %v829_v18 = vpop.f32.mrf.mxu0 }
 0x6ac   :  { %v587_v20 = vmax.f32 %v585_v17, 0.0 }
 0x6ae   :  { %v588_v21 = vadd.f32 %v587_v20, %v586_v19 }
 0x6b0   :  { %v589_v22 = vrot.slane %v588_v21, 4 }
 0x6b2   :  { %v590_v23 = vadd.f32 %v589_v22, %v588_v21 }
 0x6b4   :  { %v591_v24 = vrot.slane %v590_v23, 2 }
 0x6b6   :  { %v592_v0 = vadd.f32 %v591_v24, %v590_v23 }
 0x6b8   :  { %v593_v26 = vrot.slane %v592_v0, 1 }
 0x6ba   :  { %v594_v27 = vadd.f32 %v593_v26, %v592_v0 }
 0x6bc   :  { %v596_v28 = vmul.f32 0.0625, %v594_v27 }
 0x6be   :  { %v597_v29 = vsel %vm345_vm6, 1.0, %v596_v28 }
 0x6bf   :  { %863 = vmatmul.mubr.f32.vlgmr.msra.gmra.mxu1 %v597_v29 }
 0x77f   :  { %v680_v30 = vpop.f32.mrf.mxu1 }
 0x780   :  { %v685_v31 = vsel %vm684_vm7, %v680_v30, -1e+30 }
 0x781   :  { %v864_v32 = vpop.f32.mrf.mxu1  ;;  %v687_v33 = vsel %vm686_vm8, %v685_v31, -inf }
 0x782   :  { %688 = vmax.xlane.f32.xlu0 %v687_v33 }
 0x80b   :  { %v689_v34 = vpop.xlane.xlu0 %688 }
 0x80c   :  { %v690_v35 = vsub.f32 %v685_v31, %v689_v34 }
 0x80e   :  { %v691_v36 = vmul.f32 1.442695, %v690_v35 }
 0x810   :  { %916 = vpow2.f32 %v691_v36 }
 0x81d   :  { %v917_v37 = vpop.eup %916 }
 0x81e   :  { %v693_v40 = vsel %vm686_vm8, %v917_v37, 0.0 }
 0x81f   :  { %694 = vadd.xlane.f32.xlu0 %v693_v40 }
 0x8a8   :  { %v695_v41 = vpop.xlane.xlu0 %694 }
 0x8a9   :  { %918 = vlog2.f32 %v695_v41 }
 0x8b6   :  { %v919_v42 = vpop.eup %918 }
 0x8b7   :  { %v697_v43 = vmul.f32 0.6931472, %v919_v42 }
 0x8b9   :  { %v698_v9 = vsub.f32 %v690_v35, %v697_v43 }
 0x8bb   :  { %v702_v44 = vrot.slane %v698_v9, %v1136_v25 }
 0x8bd   :  { %703 = vst [vmem:[#allocation11] sm:$0xff] %v702_v44 }
 0x8be   :  { %1031 = shalt.err (!%p1028_p1)
}
 0x8bf   :  { %713 = dma.vmem_to_hbm [thread:$0]  %s711_s21, 128, %s1223_s5, [#allocation4]  }
 0x8c0   :  { %1046 = dma.done.wait [#allocation4], 128  }
 0x8c1   :  { %1047 = vsyncadd [#allocation4], 4294967168 }
 0x8c2   :  { %717 = vsyncpa [#allocation3], 1 }
 0x8c3   :  { %718 = vsyncpa [#allocation6], 1 }
 0x8c4   :  { %719 = vsyncpa [#allocation9], 1 }
 0x8c5   :  { %720 = vsyncpa [#allocation4], 1 }

</bundles_post_ra>
